<compile_context>
chip_gen: v7x
topology: tpu7x:2x2x1
jax: 0.10.0
libtpu: 0.0.40
codegen_flags: <defaults>
</compile_context>

<pallas_src>
import functools
import math

import jax
import jax.numpy as jnp
from jax.experimental import pallas as pl
from jax.experimental.pallas import tpu as pltpu


def value_net_kernel(xt_ref, w1_ref, b1_ref, w2_ref, b2_ref, w3_ref, b3_ref, o_ref):
    # fc1 + ReLU : (fc1, D_in) @ (D_in, TB) -> (fc1, TB); bf16 MXU, f32 acc.
    xt = xt_ref[...].astype(jnp.bfloat16)
    h1 = jnp.dot(w1_ref[...], xt, preferred_element_type=jnp.float32)
    h1 = jnp.maximum(h1 + b1_ref[...], 0.0)
    # fc2 + ReLU : (fc2, fc1) @ (fc1, TB) -> (fc2, TB)
    h2 = jnp.dot(w2_ref[...], h1.astype(jnp.bfloat16),
                 preferred_element_type=jnp.float32)
    h2 = jnp.maximum(h2 + b2_ref[...], 0.0)
    # Value head (fc2 -> 1), kept in f32: tiny (1, fc2) @ (fc2, TB) pass whose
    # result is already the lane-dense (1, TB) output row.
    v = jnp.dot(w3_ref[...], h2, preferred_element_type=jnp.float32)
    o_ref[...] = (v + b3_ref[0, 0]).astype(o_ref.dtype)


def _round_up(x: int, m: int) -> int:
    return ((x + m - 1) // m) * m


def _pick_batch_tile(B: int, block_b: int) -> int:
    if B <= 256:
        # Single grid step: tile == whole (padded) batch; round to 16 so the
        # bf16 casts keep fully packed sublane pairs.
        return _round_up(B, 16)
    # Multi-step grid: lane-dense (d, TB) blocks need TB % 128 == 0. Cap at
    # ~B/2 so there are always >= 2 grid steps (keeps both v7x TCs busy).
    return min(block_b, _round_up(pl.cdiv(B, 2), 128))


def prepare_params(params):
    """One-time conversion of the f32 masters (PyTorch layout) into the
    kernel-ready replica pytree: bf16 MXU weights, column biases, f32 head
    row, SMEM scalar bias. Build this once (e.g. after each optimizer step)
    and reuse it across forward calls so the casts are not paid per call."""
    fc1 = params["W1"].shape[0]
    fc2 = params["W2"].shape[0]
    return {
        "w1": params["W1"].astype(jnp.bfloat16),                  # (fc1, D_in)
        "b1": params["b1"].reshape(fc1, 1).astype(jnp.float32),   # column
        "w2": params["W2"].astype(jnp.bfloat16),                  # (fc2, fc1)
        "b2": params["b2"].reshape(fc2, 1).astype(jnp.float32),   # column
        "w3": params["W3"].reshape(1, fc2).astype(jnp.float32),   # f32 head row
        "b3": params["b3"].reshape(1, 1).astype(jnp.float32),     # SMEM scalar
    }


@functools.partial(jax.jit, static_argnames=("block_b",))
def value_network_forward(state, kparams, *, block_b=1024):
    """state: (B, D_in) float32.  kparams: output of prepare_params()."""
    B, d_in = state.shape
    fc1 = kparams["w1"].shape[0]
    fc2 = kparams["w2"].shape[0]

    TB = _pick_batch_tile(B, block_b)
    B_pad = _round_up(B, TB)
    if B_pad != B:
        state = jnp.pad(state, ((0, B_pad - B), (0, 0)))
    xt = state.T                                                  # (D_in, B_pad)

    def resident(shape):
        # Constant index map -> block stays in VMEM across all grid steps;
        # single-buffered since it never changes.
        return pl.BlockSpec(shape, lambda i: (0, 0), pipeline_mode=pl.Buffered(1))

    out = pl.pallas_call(
        value_net_kernel,
        out_shape=jax.ShapeDtypeStruct((1, B_pad), jnp.float32),
        grid_spec=pltpu.PrefetchScalarGridSpec(
            num_scalar_prefetch=0,
            grid=(B_pad // TB,),
            in_specs=[
                pl.BlockSpec((d_in, TB), lambda i: (0, i)),          # x^T tile (pipelined)
                resident((fc1, d_in)),                               # W1 (bf16)
                resident((fc1, 1)),                                  # b1 column
                resident((fc2, fc1)),                                # W2 (bf16)
                resident((fc2, 1)),                                  # b2 column
                resident((1, fc2)),                                  # W3 row (f32)
                pl.BlockSpec(memory_space=pltpu.MemorySpace.SMEM),   # b3 scalar
            ],
            out_specs=pl.BlockSpec((1, TB), lambda i: (0, i)),       # lane-dense row
        ),
        compiler_params=pltpu.CompilerParams(
            dimension_semantics=("parallel",),
        ),
    )(xt, kparams["w1"], kparams["b1"], kparams["w2"], kparams["b2"],
      kparams["w3"], kparams["b3"])

    # Padded batch columns (B..B_pad-1) hold garbage (ReLU(b) path); slice off.
    return out[0, :B].reshape(B, 1)


def init_params(key, input_dims, fc1_dims=256, fc2_dims=256):
    """f32 master params in PyTorch nn.Linear layout: W (out, in), b (out,),
    initialized U(-1/sqrt(fan_in), 1/sqrt(fan_in)) like nn.Linear's default."""
    def linear(k, fan_in, fan_out):
        kw, kb = jax.random.split(k)
        bound = 1.0 / math.sqrt(fan_in)
        W = jax.random.uniform(kw, (fan_out, fan_in), jnp.float32, -bound, bound)
        b = jax.random.uniform(kb, (fan_out,), jnp.float32, -bound, bound)
        return W, b

    k1, k2, k3 = jax.random.split(key, 3)
    W1, b1 = linear(k1, input_dims, fc1_dims)
    W2, b2 = linear(k2, fc1_dims, fc2_dims)
    W3, b3 = linear(k3, fc2_dims, 1)
    return {"W1": W1, "b1": b1, "W2": W2, "b2": b2, "W3": W3, "b3": b3}


if __name__ == "__main__":
    key = jax.random.PRNGKey(0)
    k_params, k_state = jax.random.split(key)

    # Small shapes consistent with the module: input_dims=(8,), batch=8.
    batch, input_dims, fc1_dims, fc2_dims = 8, 8, 256, 256

    params = init_params(k_params, input_dims, fc1_dims, fc2_dims)
    kparams = prepare_params(params)     # bf16 casts hoisted; reused per call
    state = jax.random.normal(k_state, (batch, input_dims), jnp.float32)

    # TODO(synk): optimizer (Adam) state and checkpoint file I/O from the
    # PyTorch module are host-side concerns, not part of the forward kernel.
    v = value_network_forward(state, kparams)
    v = jax.block_until_ready(v)

    # Pure-JAX f32 reference (PyTorch layout: y = x @ W.T + b).
    h1 = jnp.maximum(state @ params["W1"].T + params["b1"], 0.0)
    h2 = jnp.maximum(h1 @ params["W2"].T + params["b2"], 0.0)
    v_ref = h2 @ params["W3"].T + params["b3"]
    assert v.shape == (batch, 1)
    assert jnp.allclose(v, v_ref, atol=2e-2, rtol=2e-2), \
        float(jnp.max(jnp.abs(v - v_ref)))

    print("KERNEL_OK")
</pallas_src>

<mosaic_0001>
module attributes {stable_mosaic.version = 11 : i64} {
  func.func @value_net_kernel(%arg0: i32, %arg1: memref<8x16xf32, #tpu.memory_space<vmem>>, %arg2: memref<256x8xbf16, #tpu.memory_space<vmem>>, %arg3: memref<256x1xf32, #tpu.memory_space<vmem>>, %arg4: memref<256x256xbf16, #tpu.memory_space<vmem>>, %arg5: memref<256x1xf32, #tpu.memory_space<vmem>>, %arg6: memref<1x256xf32, #tpu.memory_space<vmem>>, %arg7: memref<1x1xf32, #tpu.memory_space<smem>>, %arg8: memref<1x16xf32, #tpu.memory_space<vmem>>) attributes {dimension_semantics = [#tpu.dimension_semantics<parallel>], iteration_bounds = array<i64: 1>, scalar_prefetch = 0 : i64, scratch_operands = 0 : i64, tpu.core_type = #tpu.core_type<tc>, window_params = [{transform_indices = @transform_0, window_bounds = array<i64: 8, 16>}, {pipeline_mode = #tpu.pipeline_mode<synchronous>, transform_indices = @transform_1, window_bounds = array<i64: 256, 8>}, {pipeline_mode = #tpu.pipeline_mode<synchronous>, transform_indices = @transform_2, window_bounds = array<i64: 256, 1>}, {pipeline_mode = #tpu.pipeline_mode<synchronous>, transform_indices = @transform_3, window_bounds = array<i64: 256, 256>}, {pipeline_mode = #tpu.pipeline_mode<synchronous>, transform_indices = @transform_4, window_bounds = array<i64: 256, 1>}, {pipeline_mode = #tpu.pipeline_mode<synchronous>, transform_indices = @transform_5, window_bounds = array<i64: 1, 256>}, {transform_indices = @transform_6, window_bounds = array<i64: 1, 1>}, {transform_indices = @transform_7, window_bounds = array<i64: 1, 16>}]} {
    %c0 = arith.constant 0 : index
    %c0_0 = arith.constant 0 : index
    %0 = vector.load %arg1[%c0, %c0_0] : memref<8x16xf32, #tpu.memory_space<vmem>>, vector<8x16xf32>
    %1 = arith.truncf %0 : vector<8x16xf32> to vector<8x16xbf16>
    %c0_1 = arith.constant 0 : index
    %c0_2 = arith.constant 0 : index
    %2 = vector.load %arg2[%c0_1, %c0_2] : memref<256x8xbf16, #tpu.memory_space<vmem>>, vector<256x8xbf16>
    %cst = arith.constant dense<0.000000e+00> : vector<256x16xf32>
    %3 = tpu.matmul %2, %1, %cst {dimension_numbers = #tpu.dot_dimension_numbers<[1], [0], [0], [1], [0, 0, 1, 1], [], []>} : vector<256x8xbf16>, vector<8x16xbf16>, vector<256x16xf32> -> vector<256x16xf32>
    %c0_3 = arith.constant 0 : index
    %c0_4 = arith.constant 0 : index
    %4 = vector.load %arg3[%c0_3, %c0_4] : memref<256x1xf32, #tpu.memory_space<vmem>>, vector<256x1xf32>
    %5 = vector.broadcast %4 : vector<256x1xf32> to vector<256x16xf32>
    %6 = arith.addf %3, %5 : vector<256x16xf32>
    %cst_5 = arith.constant 0.000000e+00 : f32
    %7 = vector.broadcast %cst_5 : f32 to vector<256x16xf32>
    %8 = arith.maximumf %6, %7 : vector<256x16xf32>
    %c0_6 = arith.constant 0 : index
    %c0_7 = arith.constant 0 : index
    %9 = vector.load %arg4[%c0_6, %c0_7] : memref<256x256xbf16, #tpu.memory_space<vmem>>, vector<256x256xbf16>
    %10 = arith.truncf %8 : vector<256x16xf32> to vector<256x16xbf16>
    %cst_8 = arith.constant dense<0.000000e+00> : vector<256x16xf32>
    %11 = tpu.matmul %9, %10, %cst_8 {dimension_numbers = #tpu.dot_dimension_numbers<[1], [0], [0], [1], [0, 0, 1, 1], [], []>} : vector<256x256xbf16>, vector<256x16xbf16>, vector<256x16xf32> -> vector<256x16xf32>
    %c0_9 = arith.constant 0 : index
    %c0_10 = arith.constant 0 : index
    %12 = vector.load %arg5[%c0_9, %c0_10] : memref<256x1xf32, #tpu.memory_space<vmem>>, vector<256x1xf32>
    %13 = vector.broadcast %12 : vector<256x1xf32> to vector<256x16xf32>
    %14 = arith.addf %11, %13 : vector<256x16xf32>
    %cst_11 = arith.constant 0.000000e+00 : f32
    %15 = vector.broadcast %cst_11 : f32 to vector<256x16xf32>
    %16 = arith.maximumf %14, %15 : vector<256x16xf32>
    %c0_12 = arith.constant 0 : index
    %c0_13 = arith.constant 0 : index
    %17 = vector.load %arg6[%c0_12, %c0_13] : memref<1x256xf32, #tpu.memory_space<vmem>>, vector<1x256xf32>
    %cst_14 = arith.constant dense<0.000000e+00> : vector<1x16xf32>
    %18 = tpu.matmul %17, %16, %cst_14 {dimension_numbers = #tpu.dot_dimension_numbers<[1], [0], [0], [1], [0, 0, 1, 1], [], []>} : vector<1x256xf32>, vector<256x16xf32>, vector<1x16xf32> -> vector<1x16xf32>
    %c0_15 = arith.constant 0 : index
    %c0_16 = arith.constant 0 : index
    %19 = memref.load %arg7[%c0_15, %c0_16] : memref<1x1xf32, #tpu.memory_space<smem>>
    %20 = vector.broadcast %19 : f32 to vector<1x16xf32>
    %21 = arith.addf %18, %20 : vector<1x16xf32>
    %c0_17 = arith.constant 0 : index
    %c0_18 = arith.constant 0 : index
    %22 = vector.load %arg8[%c0_17, %c0_18] : memref<1x16xf32, #tpu.memory_space<vmem>>, vector<1x16xf32>
    tpu.vector_store %arg8[%c0_17, %c0_18], %21 {strides = array<i32>} : memref<1x16xf32, #tpu.memory_space<vmem>>, vector<1x16xf32>,
    return
  }
  func.func @transform_0(%arg0: i32) -> (i32, i32) {
    %c0_i32 = arith.constant 0 : i32
    %c0_i32_0 = arith.constant 0 : i32
    return %c0_i32, %arg0 : i32, i32
  }
  func.func @transform_1(%arg0: i32) -> (i32, i32) {
    %c0_i32 = arith.constant 0 : i32
    %c0_i32_0 = arith.constant 0 : i32
    %c0_i32_1 = arith.constant 0 : i32
    return %c0_i32, %c0_i32_0 : i32, i32
  }
  func.func @transform_2(%arg0: i32) -> (i32, i32) {
    %c0_i32 = arith.constant 0 : i32
    %c0_i32_0 = arith.constant 0 : i32
    %c0_i32_1 = arith.constant 0 : i32
    return %c0_i32, %c0_i32_0 : i32, i32
  }
  func.func @transform_3(%arg0: i32) -> (i32, i32) {
    %c0_i32 = arith.constant 0 : i32
    %c0_i32_0 = arith.constant 0 : i32
    %c0_i32_1 = arith.constant 0 : i32
    return %c0_i32, %c0_i32_0 : i32, i32
  }
  func.func @transform_4(%arg0: i32) -> (i32, i32) {
    %c0_i32 = arith.constant 0 : i32
    %c0_i32_0 = arith.constant 0 : i32
    %c0_i32_1 = arith.constant 0 : i32
    return %c0_i32, %c0_i32_0 : i32, i32
  }
  func.func @transform_5(%arg0: i32) -> (i32, i32) {
    %c0_i32 = arith.constant 0 : i32
    %c0_i32_0 = arith.constant 0 : i32
    %c0_i32_1 = arith.constant 0 : i32
    return %c0_i32, %c0_i32_0 : i32, i32
  }
  func.func @transform_6(%arg0: i32) -> (i32, i32) {
    %c0_i32 = arith.constant 0 : i32
    %c0_i32_0 = arith.constant 0 : i32
    %c0_i32_1 = arith.constant 0 : i32
    return %c0_i32, %c0_i32_0 : i32, i32
  }
  func.func @transform_7(%arg0: i32) -> (i32, i32) {
    %c0_i32 = arith.constant 0 : i32
    %c0_i32_0 = arith.constant 0 : i32
    return %c0_i32, %arg0 : i32, i32
  }
}

</mosaic_0001>

<bundles_post_ra>
// kernel: value_network_forward.1
= control target key start
LH: loop header
LB: loop body
LE: loop exit
PB: predicated region body
PF: predicated region fallthrough
CT: control target
= control target key end

     0   :  { %v1641_v0 = vmov 0   ;;  %vm383_vm0 = vcmask 1043456   ;;  %vm334_vm1 = vcmask 64512   ;;  %vm1257_vm2 = vcmask 122880   ;;  %s2219_s2 = inlined_call_operand.vmem [shape: f32[256,1], index: 2, kind: input, shape index: {}]   ;;  %s2220_s0 = inlined_call_operand.vmem [shape: f32[8,16], index: 0, kind: input, shape index: {}]   ;;  %s2221_s1 = inlined_call_operand.vmem [shape: bf16[256,8], index: 1, kind: input, shape index: {}]   ;;  %s2222_s4 = inlined_call_operand.vmem [shape: f32[256,1], index: 4, kind: input, shape index: {}]   ;;  %s2223_s3 = inlined_call_operand.vmem [shape: bf16[256,256], index: 3, kind: input, shape index: {}]   ;;  %s2224_s5 = inlined_call_operand.vmem [shape: f32[1,256], index: 5, kind: input, shape index: {}]   ;;  %s2225_s6 = inlined_call_operand.<no memory space> [shape: f32[1,1], index: 6, kind: input, shape index: {}]   ;;  %s2226_s7 = inlined_call_operand.vmem [shape: f32[1,16], index: 7, kind: output, shape index: {}]  }
   0x1   :  { %1576 = vset.pattern.permute.xlu1 %v1641_v0  ;;  %1575 = vset.pattern.permute.xlu0 %v1641_v0  ;;  %v78_v1 = vld [vmem:[%s2219_s2 + $0x80] sm:$0xff]  ;;  %v79_v5 = vld [vmem:[%s2219_s2 + $0x88] sm:$0xff]  ;;  %v80_v10 = vld [vmem:[%s2219_s2 + $0x90] sm:$0xff] }
   0x2   :  { %v62_v2 = vld [vmem:[%s2219_s2] sm:$0xff]  ;;  %176 = vperm.xlu0 %1575, %v78_v1   ;;  %v63_v6 = vld [vmem:[%s2219_s2 + $0x8] sm:$0xff]  ;;  %v1579_v11 = vld [vmem:[%s2221_s1 + $0x10] sm:$0xff]  }
   0x3   :  { %v28_v3 = vld [vmem:[%s2220_s0] sm:$0xff]  ;;  %96 = vperm.xlu1 %1576, %v62_v2   ;;  %v1578_v9 = vld [vmem:[%s2221_s1 + $0x8] sm:$0xff]   ;;  %v81_v12 = vld [vmem:[%s2219_s2 + $0x98] sm:$0xff] }
   0x4   :  { %v29_v4 = vpack.c.bf16 %v28_v3, %v28_v3  ;;  %v1577_v7 = vld [vmem:[%s2221_s1] sm:$0xff]   ;;  %v64_v13 = vld [vmem:[%s2219_s2 + $0x10] sm:$0xff]  ;;  %v65_v14 = vld [vmem:[%s2219_s2 + $0x18] sm:$0xff] }
   0x5   :  { %1493 = vmatprep.mubr.msk.bf16.mxu0 %vm334_vm1, %v1577_v7  ;;  %v1580_v15 = vld [vmem:[%s2221_s1 + $0x18] sm:$0xff]   ;;  %v1581_v16 = vld [vmem:[%s2221_s1 + $0x20] sm:$0xff]   ;;  %v83_v18 = vld [vmem:[%s2219_s2 + $0xa8] sm:$0xff] }
   0x6   :  { %1573 = vmatprep.subr.msk.bf16.mxu0 %vm383_vm0, %v29_v4  ;;  %v385_v8 = vsel %vm383_vm0, %v29_v4, 0  ;;  %181 = vperm.xlu0 %1575, %v79_v5   ;;  %v82_v17 = vld [vmem:[%s2219_s2 + $0xa0] sm:$0xff]  ;;  %v67_v20 = vld [vmem:[%s2219_s2 + $0x28] sm:$0xff]  ;;  %v1583_v22 = vld [vmem:[%s2221_s1 + $0x30] sm:$0xff]  }
   0x7   :  { %1492 = vmatpush3.bf16.msra.mxu0 %v385_v8  ;;  %101 = vperm.xlu1 %1576, %v63_v6   ;;  %v66_v19 = vld [vmem:[%s2219_s2 + $0x20] sm:$0xff]  ;;  %v1582_v21 = vld [vmem:[%s2221_s1 + $0x28] sm:$0xff]   ;;  %v84_v23 = vld [vmem:[%s2219_s2 + $0xb0] sm:$0xff] }
   0x8   :  { %v85_v24 = vld [vmem:[%s2219_s2 + $0xb8] sm:$0xff]  ;;  %v68_v25 = vld [vmem:[%s2219_s2 + $0x30] sm:$0xff]  ;;  %v1585_v28 = vld [vmem:[%s2221_s1 + $0x40] sm:$0xff]  }
   0x9   :  { %v69_v26 = vld [vmem:[%s2219_s2 + $0x38] sm:$0xff]  ;;  %v86_v29 = vld [vmem:[%s2219_s2 + $0xc0] sm:$0xff]  ;;  %v87_v30 = vld [vmem:[%s2219_s2 + $0xc8] sm:$0xff] }
   0xa   :  { %1494 = vmatmul.mubr.msk.bf16.vlgmr.msra.gmra.mrb[0].mxu0 %vm334_vm1, %v1578_v9  ;;  %186 = vperm.xlu0 %1575, %v80_v10   ;;  %v1584_v27 = vld [vmem:[%s2221_s1 + $0x38] sm:$0xff]   ;;  %v70_v31 = vld [vmem:[%s2219_s2 + $0x40] sm:$0xff]  ;;  %v71_v32 = vld [vmem:[%s2219_s2 + $0x48] sm:$0xff] }
   0xb   :  { %1497 = vmatprep.mubr.msk.bf16.mxu0 %vm334_vm1, %v1579_v11  ;;  %191 = vperm.xlu1 %1576, %v81_v12   ;;  %v1586_v33 = vld [vmem:[%s2221_s1 + $0x48] sm:$0xff]   ;;  %v1587_v34 = vld [vmem:[%s2221_s1 + $0x50] sm:$0xff]   ;;  %v89_v36 = vld [vmem:[%s2219_s2 + $0xd8] sm:$0xff] }
   0xc   :  { %v88_v35 = vld [vmem:[%s2219_s2 + $0xd0] sm:$0xff]  ;;  %v73_v38 = vld [vmem:[%s2219_s2 + $0x58] sm:$0xff]  ;;  %v1589_v40 = vld [vmem:[%s2221_s1 + $0x60] sm:$0xff]  }
   0xd   :  { %v72_v37 = vld [vmem:[%s2219_s2 + $0x50] sm:$0xff]  ;;  %v1588_v39 = vld [vmem:[%s2221_s1 + $0x58] sm:$0xff]   ;;  %v90_v41 = vld [vmem:[%s2219_s2 + $0xe0] sm:$0xff] }
   0xe   :  { %106 = vperm.xlu0 %1575, %v64_v13   ;;  %v91_v42 = vld [vmem:[%s2219_s2 + $0xe8] sm:$0xff]  ;;  %v74_v43 = vld [vmem:[%s2219_s2 + $0x60] sm:$0xff]  ;;  %v1591_v46 = vld [vmem:[%s2221_s1 + $0x70] sm:$0xff]  }
   0xf   :  { %111 = vperm.xlu1 %1576, %v65_v14   ;;  %v75_v44 = vld [vmem:[%s2219_s2 + $0x68] sm:$0xff]  ;;  %v92_v47 = vld [vmem:[%s2219_s2 + $0xf0] sm:$0xff]  ;;  %v93_v48 = vld [vmem:[%s2219_s2 + $0xf8] sm:$0xff] }
  0x10   :  { %v1590_v45 = vld [vmem:[%s2221_s1 + $0x68] sm:$0xff]   ;;  %v76_v49 = vld [vmem:[%s2219_s2 + $0x70] sm:$0xff]  ;;  %v77_v50 = vld [vmem:[%s2219_s2 + $0x78] sm:$0xff] }
  0x11   :  { %v1592_v51 = vld [vmem:[%s2221_s1 + $0x78] sm:$0xff]   ;;  %v644_v52 = vld [vmem:[%s2222_s4 + $0x80] sm:$0xff]  ;;  %v645_v53 = vld [vmem:[%s2222_s4 + $0x88] sm:$0xff] }
  0x12   :  { %1498 = vmatmul.mubr.msk.bf16.gmra.mrb[4].mxu0 %vm334_vm1, %v1580_v15  ;;  %196 = vperm.xlu0 %1575, %v82_v17   ;;  %v628_v54 = vld [vmem:[%s2222_s4] sm:$0xff]  ;;  %v629_v55 = vld [vmem:[%s2222_s4 + $0x8] sm:$0xff]  ;;  %v646_v56 = vld [vmem:[%s2222_s4 + $0x90] sm:$0xff] }
  0x13   :  { %1501 = vmatprep.mubr.msk.bf16.mxu0 %vm334_vm1, %v1581_v16  ;;  %201 = vperm.xlu1 %1576, %v83_v18   ;;  %v647_v57 = vld [vmem:[%s2222_s4 + $0x98] sm:$0xff]  ;;  %v630_v58 = vld [vmem:[%s2222_s4 + $0x10] sm:$0xff]  ;;  %v648_v60 = vld [vmem:[%s2222_s4 + $0xa0] sm:$0xff] }
  0x14   :  { %v631_v59 = vld [vmem:[%s2222_s4 + $0x18] sm:$0xff]  ;;  %v649_v61 = vld [vmem:[%s2222_s4 + $0xa8] sm:$0xff]  ;;  %v632_v62 = vld [vmem:[%s2222_s4 + $0x20] sm:$0xff] }
  0x15   :  { %v633_v63 = vld [vmem:[%s2222_s4 + $0x28] sm:$0xff]  ;;  %v650_v0 = vld [vmem:[%s2222_s4 + $0xb0] sm:$0xff]  ;;  %v651_v1 = vld [vmem:[%s2222_s4 + $0xb8] sm:$0xff] }
  0x16   :  { %116 = vperm.xlu0 %1575, %v66_v19   ;;  %v634_v2 = vld [vmem:[%s2222_s4 + $0x30] sm:$0xff]  ;;  %v635_v3 = vld [vmem:[%s2222_s4 + $0x38] sm:$0xff]  ;;  %v652_v4 = vld [vmem:[%s2222_s4 + $0xc0] sm:$0xff] }
  0x17   :  { %121 = vperm.xlu1 %1576, %v67_v20   ;;  %v653_v5 = vld [vmem:[%s2222_s4 + $0xc8] sm:$0xff]  ;;  %v636_v6 = vld [vmem:[%s2222_s4 + $0x40] sm:$0xff]  ;;  %v654_v8 = vld [vmem:[%s2222_s4 + $0xd0] sm:$0xff] }
  0x18   :  { %v637_v7 = vld [vmem:[%s2222_s4 + $0x48] sm:$0xff]  ;;  %v655_v9 = vld [vmem:[%s2222_s4 + $0xd8] sm:$0xff]  ;;  %v638_v10 = vld [vmem:[%s2222_s4 + $0x50] sm:$0xff] }
  0x19   :  { %v639_v11 = vld [vmem:[%s2222_s4 + $0x58] sm:$0xff]  ;;  %v656_v12 = vld [vmem:[%s2222_s4 + $0xe0] sm:$0xff]  ;;  %v657_v13 = vld [vmem:[%s2222_s4 + $0xe8] sm:$0xff] }
  0x1a   :  { %1502 = vmatmul.mubr.msk.bf16.gmra.mrb[8].mxu0 %vm334_vm1, %v1582_v21  ;;  %206 = vperm.xlu0 %1575, %v84_v23   ;;  %v640_v14 = vld [vmem:[%s2222_s4 + $0x60] sm:$0xff]  ;;  %v641_v15 = vld [vmem:[%s2222_s4 + $0x68] sm:$0xff]  ;;  %v658_v16 = vld [vmem:[%s2222_s4 + $0xf0] sm:$0xff] }
  0x1b   :  { %1505 = vmatprep.mubr.msk.bf16.mxu0 %vm334_vm1, %v1583_v22  ;;  %211 = vperm.xlu1 %1576, %v85_v24   ;;  %v659_v17 = vld [vmem:[%s2222_s4 + $0xf8] sm:$0xff]  ;;  %v642_v18 = vld [vmem:[%s2222_s4 + $0x70] sm:$0xff]  ;;  %v1595_v24 = vld [vmem:[%s2223_s3 + $0x4] ss:$8 sps:$4 sm:$0xff]  }
  0x1c   :  { %v643_v19 = vld [vmem:[%s2222_s4 + $0x78] sm:$0xff] }
  0x1e   :  { %126 = vperm.xlu0 %1575, %v68_v25   ;;  %v1598_v25 = vld [vmem:[%s2223_s3 + $0x54] ss:$8 sps:$4 sm:$0xff]  }
  0x1f   :  { %131 = vperm.xlu1 %1576, %v69_v26   ;;  %1052 = vmatprep.mubr.bf16.mxu1 %v1598_v25 }
  0x22   :  { %1506 = vmatmul.mubr.msk.bf16.gmra.mrb[12].mxu0 %vm334_vm1, %v1584_v27  ;;  %216 = vperm.xlu0 %1575, %v86_v29  }
  0x23   :  { %1509 = vmatprep.mubr.msk.bf16.mxu0 %vm334_vm1, %v1585_v28  ;;  %221 = vperm.xlu1 %1576, %v87_v30  }
  0x26   :  { %136 = vperm.xlu0 %1575, %v70_v31  }
  0x27   :  { %141 = vperm.xlu1 %1576, %v71_v32  }
  0x2a   :  { %1510 = vmatmul.mubr.msk.bf16.gmra.mrb[16].mxu0 %vm334_vm1, %v1586_v33  ;;  %226 = vperm.xlu0 %1575, %v88_v35  }
  0x2b   :  { %1513 = vmatprep.mubr.msk.bf16.mxu0 %vm334_vm1, %v1587_v34  ;;  %231 = vperm.xlu1 %1576, %v89_v36  }
  0x2e   :  { %146 = vperm.xlu0 %1575, %v72_v37  }
  0x2f   :  { %151 = vperm.xlu1 %1576, %v73_v38  }
  0x32   :  { %1514 = vmatmul.mubr.msk.bf16.gmra.mrb[20].mxu0 %vm334_vm1, %v1588_v39  ;;  %236 = vperm.xlu0 %1575, %v90_v41  }
  0x33   :  { %1517 = vmatprep.mubr.msk.bf16.mxu0 %vm334_vm1, %v1589_v40  ;;  %241 = vperm.xlu1 %1576, %v91_v42  }
  0x36   :  { %156 = vperm.xlu0 %1575, %v74_v43  }
  0x37   :  { %161 = vperm.xlu1 %1576, %v75_v44  }
  0x3a   :  { %1518 = vmatmul.mubr.msk.bf16.gmra.mrb[24].mxu0 %vm334_vm1, %v1590_v45  ;;  %246 = vperm.xlu0 %1575, %v92_v47  }
  0x3b   :  { %1521 = vmatprep.mubr.msk.bf16.mxu0 %vm334_vm1, %v1591_v46  ;;  %251 = vperm.xlu1 %1576, %v93_v48  }
  0x3e   :  { %166 = vperm.xlu0 %1575, %v76_v49  }
  0x3f   :  { %171 = vperm.xlu1 %1576, %v77_v50  }
  0x42   :  { %1522 = vmatmul.mubr.msk.bf16.gmra.mrb[28].mxu0 %vm334_vm1, %v1592_v51  ;;  %742 = vperm.xlu0 %1575, %v644_v52  }
  0x43   :  { %747 = vperm.xlu1 %1576, %v645_v53   ;;  %1012 = vmatprep.mubr.bf16.mxu0 %v1595_v24 }
  0x46   :  { %662 = vperm.xlu0 %1575, %v628_v54  }
  0x47   :  { %667 = vperm.xlu1 %1576, %v629_v55  }
  0x4a   :  { %752 = vperm.xlu0 %1575, %v646_v56  }
  0x4b   :  { %757 = vperm.xlu1 %1576, %v647_v57  }
  0x4e   :  { %672 = vperm.xlu0 %1575, %v630_v58  }
  0x4f   :  { %677 = vperm.xlu1 %1576, %v631_v59  }
  0x52   :  { %762 = vperm.xlu0 %1575, %v648_v60  }
  0x53   :  { %767 = vperm.xlu1 %1576, %v649_v61  }
  0x56   :  { %682 = vperm.xlu0 %1575, %v632_v62  }
  0x57   :  { %687 = vperm.xlu1 %1576, %v633_v63  }
  0x5a   :  { %772 = vperm.xlu0 %1575, %v650_v0  }
  0x5b   :  { %777 = vperm.xlu1 %1576, %v651_v1  }
  0x5e   :  { %692 = vperm.xlu0 %1575, %v634_v2  }
  0x5f   :  { %697 = vperm.xlu1 %1576, %v635_v3  }
  0x62   :  { %782 = vperm.xlu0 %1575, %v652_v4  }
  0x63   :  { %787 = vperm.xlu1 %1576, %v653_v5  }
  0x66   :  { %702 = vperm.xlu0 %1575, %v636_v6  }
  0x67   :  { %707 = vperm.xlu1 %1576, %v637_v7  }
  0x6a   :  { %792 = vperm.xlu0 %1575, %v654_v8  }
  0x6b   :  { %797 = vperm.xlu1 %1576, %v655_v9  }
  0x6e   :  { %712 = vperm.xlu0 %1575, %v638_v10  }
  0x6f   :  { %717 = vperm.xlu1 %1576, %v639_v11  }
  0x72   :  { %802 = vperm.xlu0 %1575, %v656_v12  }
  0x73   :  { %807 = vperm.xlu1 %1576, %v657_v13  }
  0x76   :  { %722 = vperm.xlu0 %1575, %v640_v14  }
  0x77   :  { %727 = vperm.xlu1 %1576, %v641_v15  }
  0x7a   :  { %812 = vperm.xlu0 %1575, %v658_v16  }
  0x7b   :  { %817 = vperm.xlu1 %1576, %v659_v17  }
  0x7e   :  { %732 = vperm.xlu0 %1575, %v642_v18  }
  0x7f   :  { %737 = vperm.xlu1 %1576, %v643_v19  }
  0x81   :  { %v1941_v20 = vpop.permute.xlu0 %176 }
  0x82   :  { %v97_v21 = vpop.permute.xlu1 %96 }
  0x85   :  { %v1943_v22 = vpop.permute.xlu0 %181 }
  0x86   :  { %v102_v23 = vpop.permute.xlu1 %101 }
  0x89   :  { %v1951_v26 = vpop.permute.xlu0 %186 }
  0x8a   :  { %v1953_v27 = vpop.permute.xlu1 %191 }
  0x8d   :  { %v107_v28 = vpop.permute.xlu0 %106 }
  0x8e   :  { %v112_v29 = vpop.permute.xlu1 %111 }
  0x91   :  { %v1955_v30 = vpop.permute.xlu0 %196 }
  0x92   :  { %v1957_v31 = vpop.permute.xlu1 %201 }
  0x95   :  { %v117_v32 = vpop.permute.xlu0 %116 }
  0x96   :  { %v122_v33 = vpop.permute.xlu1 %121 }
  0x99   :  { %v1959_v34 = vpop.permute.xlu0 %206 }
  0x9a   :  { %v1961_v35 = vpop.permute.xlu1 %211 }
  0x9d   :  { %v127_v36 = vpop.permute.xlu0 %126 }
  0x9e   :  { %v132_v37 = vpop.permute.xlu1 %131 }
  0xa1   :  { %v1963_v38 = vpop.permute.xlu0 %216 }
  0xa2   :  { %v1965_v39 = vpop.permute.xlu1 %221 }
  0xa5   :  { %v137_v40 = vpop.permute.xlu0 %136 }
  0xa6   :  { %v142_v41 = vpop.permute.xlu1 %141 }
  0xa9   :  { %v1967_v42 = vpop.permute.xlu0 %226 }
  0xaa   :  { %v1969_v43 = vpop.permute.xlu1 %231 }
  0xad   :  { %v147_v45 = vpop.permute.xlu0 %146 }
  0xae   :  { %v152_v48 = vpop.permute.xlu1 %151 }
  0xb1   :  { %v1971_v56 = vpop.permute.xlu0 %236 }
  0xb2   :  { %v1975_v61 = vpop.permute.xlu1 %241 }
  0xb5   :  { %v157_v5 = vpop.permute.xlu0 %156 }
  0xb6   :  { %v162_v9 = vpop.permute.xlu1 %161 }
  0xb9   :  { %v1983_v17 = vpop.permute.xlu0 %246 }
  0xba   :  { %v1985_v24 = vpop.permute.xlu1 %251 }
  0xdd   :  { %v1495_v44 = vpop.f32.mrb[0].mxu0 }
  0xde   :  { %v421_v46 = vpop.f32.mrb[1].mxu0  ;;  %v430_v47 = vadd.f32 %v1495_v44, %v107_v28  ;;  %v167_v44 = vpop.permute.xlu0 %166 }
  0xdf   :  { %v422_v49 = vadd.f32 %v421_v46, %v97_v21  ;;  %v1496_v50 = vpop.f32.mrb[2].mxu0 }
  0xe0   :  { %v433_v51 = vadd.f32 %v1496_v50, %v112_v29  ;;  %v424_v52 = vpop.f32.mrb[3].mxu0  ;;  %v550_v54 = vmax.f32 %v430_v47, 0.0 }
  0xe1   :  { %v425_v53 = vadd.f32 %v424_v52, %v102_v23  ;;  %v548_v57 = vmax.f32 %v422_v49, 0.0  ;;  %v172_v49 = vpop.permute.xlu1 %171 }
  0xe2   :  { %v551_v55 = vmax.f32 %v433_v51, 0.0 }
  0xe3   :  { %v549_v58 = vmax.f32 %v425_v53, 0.0 }
  0xe4   :  { %v1973_v59 = vpack.c.bf16 %v551_v55, %v550_v54 }
  0xe5   :  { %v1499_v60 = vpop.f32.mrb[4].mxu0  ;;  %v1977_v62 = vpack.c.bf16 %v549_v58, %v548_v57 }
  0xe6   :  { %v437_v63 = vpop.f32.mrb[5].mxu0  ;;  %v446_v0 = vadd.f32 %v1499_v60, %v127_v36 }
  0xe7   :  { %v438_v1 = vadd.f32 %v437_v63, %v117_v32  ;;  %v1500_v2 = vpop.f32.mrb[6].mxu0 }
  0xe8   :  { %v449_v3 = vadd.f32 %v1500_v2, %v132_v37  ;;  %v440_v4 = vpop.f32.mrb[7].mxu0  ;;  %v554_v7 = vmax.f32 %v446_v0, 0.0 }
  0xe9   :  { %v441_v6 = vadd.f32 %v440_v4, %v122_v33  ;;  %v552_v10 = vmax.f32 %v438_v1, 0.0 }
  0xea   :  { %v555_v8 = vmax.f32 %v449_v3, 0.0 }
  0xeb   :  { %v553_v11 = vmax.f32 %v441_v6, 0.0 }
  0xec   :  { %v1979_v12 = vpack.c.bf16 %v555_v8, %v554_v7 }
  0xed   :  { %v1503_v13 = vpop.f32.mrb[8].mxu0  ;;  %v1981_v14 = vpack.c.bf16 %v553_v11, %v552_v10 }
  0xee   :  { %v453_v15 = vpop.f32.mrb[9].mxu0  ;;  %v462_v16 = vadd.f32 %v1503_v13, %v147_v45 }
  0xef   :  { %v454_v18 = vadd.f32 %v453_v15, %v137_v40  ;;  %v1504_v19 = vpop.f32.mrb[10].mxu0 }
  0xf0   :  { %v465_v21 = vadd.f32 %v1504_v19, %v152_v48  ;;  %v456_v23 = vpop.f32.mrb[11].mxu0  ;;  %v558_v28 = vmax.f32 %v462_v16, 0.0 }
  0xf1   :  { %v457_v25 = vadd.f32 %v456_v23, %v142_v41  ;;  %v556_v32 = vmax.f32 %v454_v18, 0.0 }
  0xf2   :  { %v559_v29 = vmax.f32 %v465_v21, 0.0 }
  0xf3   :  { %v557_v33 = vmax.f32 %v457_v25, 0.0 }
  0xf4   :  { %v1987_v36 = vpack.c.bf16 %v559_v29, %v558_v28 }
  0xf5   :  { %v1507_v37 = vpop.f32.mrb[12].mxu0  ;;  %v1989_v46 = vpack.c.bf16 %v557_v33, %v556_v32 }
  0xf6   :  { %v469_v45 = vpop.f32.mrb[13].mxu0  ;;  %v478_v47 = vadd.f32 %v1507_v37, %v167_v44 }
  0xf7   :  { %v470_v40 = vadd.f32 %v469_v45, %v157_v5  ;;  %v1508_v50 = vpop.f32.mrb[14].mxu0 }
  0xf8   :  { %v481_v48 = vadd.f32 %v1508_v50, %v172_v49  ;;  %v472_v51 = vpop.f32.mrb[15].mxu0  ;;  %v562_v53 = vmax.f32 %v478_v47, 0.0 }
  0xf9   :  { %v473_v52 = vadd.f32 %v472_v51, %v162_v9  ;;  %v560_v54 = vmax.f32 %v470_v40, 0.0 }
  0xfa   :  { %v563_v41 = vmax.f32 %v481_v48, 0.0 }
  0xfb   :  { %v561_v55 = vmax.f32 %v473_v52, 0.0 }
  0xfc   :  { %v1991_v57 = vpack.c.bf16 %v563_v41, %v562_v53 }
  0xfd   :  { %v1511_v58 = vpop.f32.mrb[16].mxu0  ;;  %v1993_v60 = vpack.c.bf16 %v561_v55, %v560_v54  ;;  %v1603_v54 = vld [vmem:[%s2223_s3 + $0x10] ss:$8 sps:$4 sm:$0xff]   ;;  %v1604_v55 = vld [vmem:[%s2223_s3 + $0x60] ss:$8 sps:$4 sm:$0xff]  }
  0xfe   :  { %v485_v63 = vpop.f32.mrb[17].mxu0  ;;  %v494_v0 = vadd.f32 %v1511_v58, %v1951_v26  ;;  %v1607_v58 = vld [vmem:[%s2223_s3 + $0x74] ss:$8 sps:$4 sm:$0xff]  }
  0xff   :  { %v486_v1 = vadd.f32 %v485_v63, %v1941_v20  ;;  %v1512_v2 = vpop.f32.mrb[18].mxu0  ;;  %v1610_v63 = vld [vmem:[%s2223_s3 + $0x70] ss:$8 sps:$4 sm:$0xff]  }
 0x100   :  { %v497_v3 = vadd.f32 %v1512_v2, %v1953_v27  ;;  %v488_v4 = vpop.f32.mrb[19].mxu0  ;;  %v566_v6 = vmax.f32 %v494_v0, 0.0  ;;  %v1611_v0 = vld [vmem:[%s2223_s3 + $0x34] ss:$8 sps:$4 sm:$0xff]   ;;  %v1615_v2 = vld [vmem:[%s2223_s3 + $0x30] ss:$8 sps:$4 sm:$0xff]  }
 0x101   :  { %v489_v5 = vadd.f32 %v488_v4, %v1943_v22  ;;  %v564_v8 = vmax.f32 %v486_v1, 0.0  ;;  %v1613_v1 = vld [vmem:[%s2223_s3 + $0x84] ss:$8 sps:$4 sm:$0xff]  }
 0x102   :  { %v567_v7 = vmax.f32 %v497_v3, 0.0  ;;  %v1616_v3 = vld [vmem:[%s2223_s3 + $0x80] ss:$8 sps:$4 sm:$0xff]   ;;  %v1617_v4 = vld [vmem:[%s2223_s3 + $0x44] ss:$8 sps:$4 sm:$0xff]  }
 0x103   :  { %v565_v9 = vmax.f32 %v489_v5, 0.0  ;;  %v1619_v5 = vld [vmem:[%s2223_s3 + $0x94] ss:$8 sps:$4 sm:$0xff]  }
 0x104   :  { %v621_v10 = vpack.c.bf16 %v567_v7, %v566_v6  ;;  %v1621_v6 = vld [vmem:[%s2223_s3 + $0x40] ss:$8 sps:$4 sm:$0xff]   ;;  %v1622_v7 = vld [vmem:[%s2223_s3 + $0x90] ss:$8 sps:$4 sm:$0xff]  }
 0x105   :  { %v1515_v11 = vpop.f32.mrb[20].mxu0  ;;  %v620_v13 = vpack.c.bf16 %v565_v9, %v564_v8  ;;  %v1623_v8 = vld [vmem:[%s2223_s3 + $0xa4] ss:$8 sps:$4 sm:$0xff]   ;;  %v1625_v9 = vld [vmem:[%s2223_s3 + $0xa0] ss:$8 sps:$4 sm:$0xff]  }
 0x106   :  { %v510_v15 = vadd.f32 %v1515_v11, %v1959_v34  ;;  %v501_v16 = vpop.f32.mrb[21].mxu0  ;;  %v1628_v11 = vld [vmem:[%s2223_s3 + $0xb0] ss:$8 sps:$4 sm:$0xff]  }
 0x107   :  { %v502_v26 = vadd.f32 %v501_v16, %v1955_v30  ;;  %v1516_v18 = vpop.f32.mrb[22].mxu0  ;;  %1344 = vmatprep.subr.bf16.mxu0 %v620_v13  ;;  %1557 = vmatprep.subr.bf16.mxu1 %v620_v13  ;;  %v1629_v13 = vld [vmem:[%s2223_s3 + $0xc4] ss:$8 sps:$4 sm:$0xff]   ;;  %v1632_v16 = vld [vmem:[%s2223_s3 + $0xd4] ss:$8 sps:$4 sm:$0xff]  }
 0x108   :  { %v513_v20 = vadd.f32 %v1516_v18, %v1961_v35  ;;  %v504_v27 = vpop.f32.mrb[23].mxu0  ;;  %1345 = vmatpush3.bf16.msra.mxu0 %v1977_v62  ;;  %1565 = vmatpush3.bf16.msra.mxu1 %v1977_v62  ;;  %v570_v19 = vmax.f32 %v510_v15, 0.0  ;;  %v1631_v15 = vld [vmem:[%s2223_s3 + $0xc0] ss:$8 sps:$4 sm:$0xff]   ;;  %v1635_v18 = vld [vmem:[%s2223_s3 + $0xe4] ss:$8 sps:$4 sm:$0xff]  }
 0x109   :  { %v505_v22 = vadd.f32 %v504_v27, %v1957_v31  ;;  %1346 = vmatprep.subr.bf16.mxu0 %v621_v10  ;;  %1558 = vmatprep.subr.bf16.mxu1 %v621_v10  ;;  %v568_v34 = vmax.f32 %v502_v26, 0.0  ;;  %v1626_v10 = vld [vmem:[%s2223_s3 + $0xb4] ss:$8 sps:$4 sm:$0xff]   ;;  %v1634_v26 = vld [vmem:[%s2223_s3 + $0xd0] ss:$8 sps:$4 sm:$0xff]  }
 0x10a   :  { %v571_v21 = vmax.f32 %v513_v20, 0.0  ;;  %v1637_v20 = vld [vmem:[%s2223_s3 + $0xe0] ss:$8 sps:$4 sm:$0xff]   ;;  %v1638_v27 = vld [vmem:[%s2223_s3 + $0xf4] ss:$8 sps:$4 sm:$0xff]  }
 0x10b   :  { %v569_v23 = vmax.f32 %v505_v22, 0.0  ;;  %v1640_v22 = vld [vmem:[%s2223_s3 + $0xf0] ss:$8 sps:$4 sm:$0xff]  }
 0x10c   :  { %v623_v25 = vpack.c.bf16 %v571_v21, %v570_v19  ;;  %1347 = vmatpush3.bf16.msra.mxu0 %v1973_v59  ;;  %1566 = vmatpush3.bf16.msra.mxu1 %v1973_v59  ;;  %v2117_v19 = vpop.permute.xlu0 %742  ;;  %v2119_v21 = vpop.permute.xlu1 %747 }
 0x10d   :  { %v622_v30 = vpack.c.bf16 %v569_v23, %v568_v34  ;;  %v1519_v35 = vpop.f32.mrb[24].mxu0 }
 0x10e   :  { %v526_v28 = vadd.f32 %v1519_v35, %v1967_v42  ;;  %v517_v31 = vpop.f32.mrb[25].mxu0 }
 0x10f   :  { %v518_v29 = vadd.f32 %v517_v31, %v1963_v38  ;;  %v1520_v32 = vpop.f32.mrb[26].mxu0  ;;  %1348 = vmatprep.subr.bf16.mxu0 %v622_v30  ;;  %1559 = vmatprep.subr.bf16.mxu1 %v622_v30 }
 0x110   :  { %v529_v62 = vadd.f32 %v1520_v32, %v1969_v43  ;;  %v520_v33 = vpop.f32.mrb[27].mxu0  ;;  %1349 = vmatpush3.bf16.msra.mxu0 %v1981_v14  ;;  %1567 = vmatpush3.bf16.msra.mxu1 %v1981_v14  ;;  %v574_v44 = vmax.f32 %v526_v28, 0.0  ;;  %v663_v34 = vpop.permute.xlu0 %662 }
 0x111   :  { %v521_v37 = vadd.f32 %v520_v33, %v1965_v39  ;;  %1350 = vmatprep.subr.bf16.mxu0 %v623_v25  ;;  %1560 = vmatprep.subr.bf16.mxu1 %v623_v25  ;;  %v572_v42 = vmax.f32 %v518_v29, 0.0  ;;  %v668_v23 = vpop.permute.xlu1 %667 }
 0x112   :  { %v575_v59 = vmax.f32 %v529_v62, 0.0 }
 0x113   :  { %v573_v45 = vmax.f32 %v521_v37, 0.0  ;;  %v1177_v37 = vlaneseq }
 0x114   :  { %v625_v47 = vpack.c.bf16 %v575_v59, %v574_v44  ;;  %1351 = vmatpush3.bf16.msra.mxu0 %v1979_v12  ;;  %1568 = vmatpush3.bf16.msra.mxu1 %v1979_v12  ;;  %v2121_v25 = vpop.permute.xlu0 %752 }
 0x115   :  { %v624_v38 = vpack.c.bf16 %v573_v45, %v572_v42  ;;  %v1523_v43 = vpop.f32.mrb[28].mxu0  ;;  %v2123_v30 = vpop.permute.xlu1 %757  ;;  %v1178_v44 = vshrl.u32 %v1177_v37, 7 }
 0x116   :  { %v542_v49 = vadd.f32 %v1523_v43, %v1983_v17  ;;  %v533_v39 = vpop.f32.mrb[29].mxu0 }
 0x117   :  { %v534_v40 = vadd.f32 %v533_v39, %v1971_v56  ;;  %v1524_v50 = vpop.f32.mrb[30].mxu0  ;;  %1352 = vmatprep.subr.bf16.mxu0 %v624_v38  ;;  %1561 = vmatprep.subr.bf16.mxu1 %v624_v38  ;;  %v1183_v45 = vsub.s32 1, %v1178_v44  ;;  %v1179_v38 = vsub.s32 0, %v1178_v44 }
 0x118   :  { %v545_v14 = vadd.f32 %v1524_v50, %v1985_v24  ;;  %v536_v48 = vpop.f32.mrb[31].mxu0  ;;  %1353 = vmatpush3.bf16.msra.mxu0 %v1989_v46  ;;  %1569 = vmatpush3.bf16.msra.mxu1 %v1989_v46  ;;  %v578_v52 = vmax.f32 %v542_v49, 0.0  ;;  %v1596_v24 = vld [vmem:[%s2223_s3 + $0x50] ss:$8 sps:$4 sm:$0xff]   ;;  %v1601_v46 = vld [vmem:[%s2223_s3 + $0x64] ss:$8 sps:$4 sm:$0xff]   ;;  %v2125_v35 = vpop.permute.xlu0 %672 }
 0x119   :  { %v537_v51 = vadd.f32 %v536_v48, %v1975_v61  ;;  %1354 = vmatprep.subr.bf16.mxu0 %v625_v47  ;;  %1562 = vmatprep.subr.bf16.mxu1 %v625_v47  ;;  %v576_v17 = vmax.f32 %v534_v40, 0.0  ;;  %v1593_v61 = vld [vmem:[%s2223_s3] ss:$8 sps:$4 sm:$0xff]   ;;  %v2127_v28 = vpop.permute.xlu1 %677 }
 0x11a   :  { %v579_v12 = vmax.f32 %v545_v14, 0.0  ;;  %v1173_v47 = vld [vmem:[%s2224_s5] sm:$0x3] }
 0x11b   :  { %v577_v53 = vmax.f32 %v537_v51, 0.0  ;;  %v1184_v43 = vrot.slane %v1173_v47, %v1183_v45  ;;  %v2146_v49 = vrot.slane %v1173_v47, %v1179_v38 }
 0x11c   :  { %v627_v41 = vpack.c.bf16 %v579_v12, %v578_v52  ;;  %1355 = vmatpush3.bf16.msra.mxu0 %v1987_v36  ;;  %1570 = vmatpush3.bf16.msra.mxu1 %v1987_v36  ;;  %v1599_v36 = vld [vmem:[%s2223_s3 + $0x14] ss:$8 sps:$4 sm:$0xff]   ;;  %v2129_v31 = vpop.permute.xlu0 %762 }
 0x11d   :  { %v626_v56 = vpack.c.bf16 %v577_v53, %v576_v17  ;;  %v2131_v29 = vpop.permute.xlu1 %767 }
 0x11f   :  { %1356 = vmatprep.subr.bf16.mxu0 %v626_v56  ;;  %1563 = vmatprep.subr.bf16.mxu1 %v626_v56 }
 0x120   :  { %1357 = vmatpush3.bf16.msra.mxu0 %v1993_v60  ;;  %1571 = vmatpush3.bf16.msra.mxu1 %v1993_v60  ;;  %v1609_v60 = vld [vmem:[%s2223_s3 + $0x20] ss:$8 sps:$4 sm:$0xff]   ;;  %v2133_v32 = vpop.permute.xlu0 %682 }
 0x121   :  { %1358 = vmatprep.subr.bf16.mxu0 %v627_v41  ;;  %1564 = vmatprep.subr.bf16.mxu1 %v627_v41  ;;  %v2135_v62 = vpop.permute.xlu1 %687 }
 0x124   :  { %1359 = vmatpush3.bf16.msra.mxu0 %v1991_v57  ;;  %1572 = vmatpush3.bf16.msra.mxu1 %v1991_v57  ;;  %v1605_v57 = vld [vmem:[%s2223_s3 + $0x24] ss:$8 sps:$4 sm:$0xff]   ;;  %v2137_v33 = vpop.permute.xlu0 %772 }
 0x125   :  { %v2139_v59 = vpop.permute.xlu1 %777 }
 0x127   :  { %1013 = vmatmul.mubr.bf16.vlgmr.msra.gmra.mrb[32].mxu0 %v1593_v61  ;;  %1053 = vmatmul.mubr.bf16.vlgmr.msra.gmra.mrb[0].mxu1 %v1596_v24 }
 0x128   :  { %1020 = vmatprep.mubr.bf16.mxu0 %v1599_v36  ;;  %1060 = vmatprep.mubr.bf16.mxu1 %v1601_v46  ;;  %v2141_v42 = vpop.permute.xlu0 %692 }
 0x129   :  { %v2148_v39 = vpop.permute.xlu1 %697 }
 0x12c   :  { %v2150_v40 = vpop.permute.xlu0 %782 }
 0x12d   :  { %v2152_v50 = vpop.permute.xlu1 %787 }
 0x12f   :  { %1021 = vmatmul.mubr.bf16.gmra.mrb[36].mxu0 %v1603_v54  ;;  %1061 = vmatmul.mubr.bf16.gmra.mrb[4].mxu1 %v1604_v55 }
 0x130   :  { %1028 = vmatprep.mubr.bf16.mxu0 %v1605_v57  ;;  %1068 = vmatprep.mubr.bf16.mxu1 %v1607_v58  ;;  %v2154_v14 = vpop.permute.xlu0 %702 }
 0x131   :  { %v2156_v48 = vpop.permute.xlu1 %707 }
 0x134   :  { %v2158_v51 = vpop.permute.xlu0 %792 }
 0x135   :  { %v2160_v52 = vpop.permute.xlu1 %797 }
 0x137   :  { %1029 = vmatmul.mubr.bf16.gmra.mrb[40].mxu0 %v1609_v60  ;;  %1069 = vmatmul.mubr.bf16.gmra.mrb[8].mxu1 %v1610_v63 }
 0x138   :  { %1036 = vmatprep.mubr.bf16.mxu0 %v1611_v0  ;;  %1076 = vmatprep.mubr.bf16.mxu1 %v1613_v1  ;;  %v713_v12 = vpop.permute.xlu0 %712 }
 0x139   :  { %v718_v17 = vpop.permute.xlu1 %717 }
 0x13c   :  { %v2162_v53 = vpop.permute.xlu0 %802 }
 0x13d   :  { %v2164_v41 = vpop.permute.xlu1 %807 }
 0x13f   :  { %1037 = vmatmul.mubr.bf16.gmra.mrb[44].mxu0 %v1615_v2  ;;  %1077 = vmatmul.mubr.bf16.gmra.mrb[12].mxu1 %v1616_v3 }
 0x140   :  { %1044 = vmatprep.mubr.bf16.mxu0 %v1617_v4  ;;  %1084 = vmatprep.mubr.bf16.mxu1 %v1619_v5  ;;  %v723_v56 = vpop.permute.xlu0 %722 }
 0x147   :  { %1045 = vmatmul.mubr.bf16.gmra.mrb[48].mxu0 %v1621_v6  ;;  %1085 = vmatmul.mubr.bf16.gmra.mrb[16].mxu1 %v1622_v7  ;;  %v728_v6 = vpop.permute.xlu1 %727  ;;  %v2166_v7 = vpop.permute.xlu0 %812 }
 0x148   :  { %1092 = vmatprep.mubr.bf16.mxu1 %v1623_v8  ;;  %1251 = vmatprep.mubr.f32.mxu0 %v1184_v43 }
 0x14f   :  { %1093 = vmatmul.mubr.bf16.gmra.mrb[20].mxu1 %v1625_v9 }
 0x150   :  { %1100 = vmatprep.mubr.bf16.mxu1 %v1626_v10 }
 0x157   :  { %1101 = vmatmul.mubr.bf16.gmra.mrb[24].mxu1 %v1628_v11 }
 0x158   :  { %1108 = vmatprep.mubr.bf16.mxu1 %v1629_v13 }
 0x15f   :  { %1109 = vmatmul.mubr.bf16.gmra.mrb[28].mxu1 %v1631_v15 }
 0x160   :  { %1116 = vmatprep.mubr.bf16.mxu1 %v1632_v16 }
 0x167   :  { %1117 = vmatmul.mubr.bf16.gmra.mrb[32].mxu1 %v1634_v26 }
 0x168   :  { %1124 = vmatprep.mubr.bf16.mxu1 %v1635_v18 }
 0x16f   :  { %1125 = vmatmul.mubr.bf16.gmra.mrb[36].mxu1 %v1637_v20 }
 0x170   :  { %1132 = vmatprep.mubr.bf16.mxu1 %v1638_v27 }
 0x177   :  { %1133 = vmatmul.mubr.bf16.gmra.mrb[40].mxu1 %v1640_v22 }
 0x1fa   :  { %v1360_v61 = vpop.f32.mrb[32].mxu0  ;;  %v1390_v24 = vpop.f32.mrb[0].mxu1 }
 0x1fb   :  { %v1361_v36 = vpop.f32.mrb[33].mxu0  ;;  %v1391_v46 = vpop.f32.mrb[1].mxu1 }
 0x1fc   :  { %v1362_v54 = vadd.f32 %v1361_v36, %v1360_v61  ;;  %v1392_v55 = vadd.f32 %v1391_v46, %v1390_v24  ;;  %v1363_v57 = vpop.f32.mrb[34].mxu0  ;;  %v1393_v58 = vpop.f32.mrb[2].mxu1 }
 0x1fd   :  { %v1364_v60 = vpop.f32.mrb[35].mxu0  ;;  %v1394_v63 = vpop.f32.mrb[3].mxu1 }
 0x1fe   :  { %v1015_v0 = vadd.f32 %v1362_v54, %v663_v34  ;;  %v1055_v1 = vadd.f32 %v1392_v55, %v713_v12  ;;  %v1365_v2 = vadd.f32 %v1364_v60, %v1363_v57  ;;  %v1395_v3 = vadd.f32 %v1394_v63, %v1393_v58  ;;  %v2174_v61 = vpop.permute.xlu1 %817  ;;  %v733_v24 = vpop.permute.xlu0 %732 }
 0x200   :  { %v1018_v4 = vadd.f32 %v1365_v2, %v668_v23  ;;  %v1058_v5 = vadd.f32 %v1395_v3, %v718_v17  ;;  %v1141_v8 = vmax.f32 %v1015_v0, 0.0  ;;  %v1151_v9 = vmax.f32 %v1055_v1, 0.0 }
 0x202   :  { %v1142_v10 = vmax.f32 %v1018_v4, 0.0  ;;  %v1152_v11 = vmax.f32 %v1058_v5, 0.0  ;;  %v1366_v13 = vpop.f32.mrb[36].mxu0  ;;  %v1396_v15 = vpop.f32.mrb[4].mxu1 }
 0x203   :  { %v1367_v16 = vpop.f32.mrb[37].mxu0  ;;  %v1397_v26 = vpop.f32.mrb[5].mxu1 }
 0x204   :  { %v2168_v18 = vpack.c.bf16 %v1142_v10, %v1141_v8  ;;  %v2170_v20 = vpack.c.bf16 %v1152_v11, %v1151_v9  ;;  %v1368_v27 = vadd.f32 %v1367_v16, %v1366_v13  ;;  %v1398_v22 = vadd.f32 %v1397_v26, %v1396_v15  ;;  %v1369_v34 = vpop.f32.mrb[38].mxu0  ;;  %v1399_v23 = vpop.f32.mrb[6].mxu1 }
 0x205   :  { %v1370_v37 = vpop.f32.mrb[39].mxu0  ;;  %v1400_v44 = vpop.f32.mrb[7].mxu1 }
 0x206   :  { %v1023_v45 = vadd.f32 %v1368_v27, %v2125_v35  ;;  %v1063_v47 = vadd.f32 %v1398_v22, %v723_v56  ;;  %v1371_v38 = vadd.f32 %v1370_v37, %v1369_v34  ;;  %v1401_v43 = vadd.f32 %v1400_v44, %v1399_v23  ;;  %v738_v10 = vpop.permute.xlu1 %737 }
 0x208   :  { %v1026_v12 = vadd.f32 %v1371_v38, %v2127_v28  ;;  %v1066_v17 = vadd.f32 %v1401_v43, %v728_v6  ;;  %v1143_v36 = vmax.f32 %v1023_v45, 0.0  ;;  %v1153_v46 = vmax.f32 %v1063_v47, 0.0 }
 0x20a   :  { %v1144_v54 = vmax.f32 %v1026_v12, 0.0  ;;  %v1154_v55 = vmax.f32 %v1066_v17, 0.0  ;;  %v1372_v57 = vpop.f32.mrb[40].mxu0  ;;  %v1402_v58 = vpop.f32.mrb[8].mxu1 }
 0x20b   :  { %v1373_v60 = vpop.f32.mrb[41].mxu0  ;;  %v1403_v63 = vpop.f32.mrb[9].mxu1 }
 0x20c   :  { %v2176_v0 = vpack.c.bf16 %v1144_v54, %v1143_v36  ;;  %v2178_v35 = vpack.c.bf16 %v1154_v55, %v1153_v46  ;;  %v1374_v56 = vadd.f32 %v1373_v60, %v1372_v57  ;;  %v1404_v1 = vadd.f32 %v1403_v63, %v1402_v58  ;;  %v1375_v2 = vpop.f32.mrb[42].mxu0  ;;  %v1405_v28 = vpop.f32.mrb[10].mxu1 }
 0x20d   :  { %v1376_v3 = vpop.f32.mrb[43].mxu0  ;;  %v1406_v4 = vpop.f32.mrb[11].mxu1 }
 0x20e   :  { %v1031_v5 = vadd.f32 %v1374_v56, %v2133_v32  ;;  %v1071_v6 = vadd.f32 %v1404_v1, %v733_v24  ;;  %v1377_v8 = vadd.f32 %v1376_v3, %v1375_v2  ;;  %v1407_v9 = vadd.f32 %v1406_v4, %v1405_v28 }
 0x210   :  { %v1034_v11 = vadd.f32 %v1377_v8, %v2135_v62  ;;  %v1074_v13 = vadd.f32 %v1407_v9, %v738_v10  ;;  %v1145_v15 = vmax.f32 %v1031_v5, 0.0  ;;  %v1155_v16 = vmax.f32 %v1071_v6, 0.0 }
 0x212   :  { %v1146_v26 = vmax.f32 %v1034_v11, 0.0  ;;  %v1156_v27 = vmax.f32 %v1074_v13, 0.0  ;;  %v1378_v22 = vpop.f32.mrb[44].mxu0  ;;  %v1408_v34 = vpop.f32.mrb[12].mxu1 }
 0x213   :  { %v1379_v23 = vpop.f32.mrb[45].mxu0  ;;  %v1409_v37 = vpop.f32.mrb[13].mxu1 }
 0x214   :  { %v2182_v44 = vpack.c.bf16 %v1146_v26, %v1145_v15  ;;  %v2184_v45 = vpack.c.bf16 %v1156_v27, %v1155_v16  ;;  %v1380_v32 = vadd.f32 %v1379_v23, %v1378_v22  ;;  %v1410_v47 = vadd.f32 %v1409_v37, %v1408_v34  ;;  %v1381_v38 = vpop.f32.mrb[46].mxu0  ;;  %v1411_v43 = vpop.f32.mrb[14].mxu1 }
 0x215   :  { %v1382_v12 = vpop.f32.mrb[47].mxu0  ;;  %v1412_v17 = vpop.f32.mrb[15].mxu1 }
 0x216   :  { %v1039_v62 = vadd.f32 %v1380_v32, %v2141_v42  ;;  %v1079_v24 = vadd.f32 %v1410_v47, %v2117_v19  ;;  %v1383_v36 = vadd.f32 %v1382_v12, %v1381_v38  ;;  %v1413_v46 = vadd.f32 %v1412_v17, %v1411_v43 }
 0x218   :  { %v1042_v54 = vadd.f32 %v1383_v36, %v2148_v39  ;;  %v1082_v55 = vadd.f32 %v1413_v46, %v2119_v21  ;;  %v1147_v57 = vmax.f32 %v1039_v62, 0.0  ;;  %v1157_v58 = vmax.f32 %v1079_v24, 0.0 }
 0x21a   :  { %v1148_v60 = vmax.f32 %v1042_v54, 0.0  ;;  %v1158_v63 = vmax.f32 %v1082_v55, 0.0  ;;  %v1384_v56 = vpop.f32.mrb[48].mxu0  ;;  %v1414_v1 = vpop.f32.mrb[16].mxu1 }
 0x21b   :  { %v1385_v2 = vpop.f32.mrb[49].mxu0  ;;  %v1415_v28 = vpop.f32.mrb[17].mxu1 }
 0x21c   :  { %v1539_v3 = vpack.c.bf16 %v1148_v60, %v1147_v57  ;;  %v1386_v4 = vadd.f32 %v1385_v2, %v1384_v56  ;;  %v1416_v5 = vadd.f32 %v1415_v28, %v1414_v1  ;;  %v1387_v42 = vpop.f32.mrb[50].mxu0  ;;  %v1417_v6 = vpop.f32.mrb[18].mxu1  ;;  %v1525_v19 = vpack.c.bf16 %v1158_v63, %v1157_v58 }
 0x21d   :  { %v1388_v8 = vpop.f32.mrb[51].mxu0  ;;  %v1418_v9 = vpop.f32.mrb[19].mxu1 }
 0x21e   :  { %v1047_v39 = vadd.f32 %v1386_v4, %v2154_v14  ;;  %v1087_v21 = vadd.f32 %v1416_v5, %v2121_v25  ;;  %v1389_v10 = vadd.f32 %v1388_v8, %v1387_v42  ;;  %v1419_v11 = vadd.f32 %v1418_v9, %v1417_v6  ;;  %1526 = vmatprep.subr.bf16.mxu0 %v1525_v19 }
 0x21f   :  { %1528 = vmatpush3.bf16.msra.mxu0 %v2168_v18 }
 0x220   :  { %v1050_v13 = vadd.f32 %v1389_v10, %v2156_v48  ;;  %v1090_v15 = vadd.f32 %v1419_v11, %v2123_v30  ;;  %v1149_v16 = vmax.f32 %v1047_v39, 0.0  ;;  %v1159_v26 = vmax.f32 %v1087_v21, 0.0 }
 0x222   :  { %v1150_v27 = vmax.f32 %v1050_v13, 0.0  ;;  %v1160_v22 = vmax.f32 %v1090_v15, 0.0  ;;  %v1420_v34 = vpop.f32.mrb[20].mxu1 }
 0x223   :  { %v1421_v23 = vpop.f32.mrb[21].mxu1 }
 0x224   :  { %v1543_v37 = vpack.c.bf16 %v1150_v27, %v1149_v16  ;;  %v1422_v32 = vadd.f32 %v1421_v23, %v1420_v34  ;;  %v1423_v14 = vpop.f32.mrb[22].mxu1  ;;  %v1529_v47 = vpack.c.bf16 %v1160_v22, %v1159_v26 }
 0x225   :  { %v1424_v25 = vpop.f32.mrb[23].mxu1 }
 0x226   :  { %v1095_v38 = vadd.f32 %v1422_v32, %v2129_v31  ;;  %v1425_v43 = vadd.f32 %v1424_v25, %v1423_v14  ;;  %1530 = vmatprep.subr.bf16.mxu0 %v1529_v47 }
 0x227   :  { %1532 = vmatpush3.bf16.msra.mxu0 %v2176_v0 }
 0x228   :  { %v1098_v48 = vadd.f32 %v1425_v43, %v2131_v29  ;;  %v1161_v30 = vmax.f32 %v1095_v38, 0.0 }
 0x22a   :  { %v1162_v18 = vmax.f32 %v1098_v48, 0.0  ;;  %v1426_v12 = vpop.f32.mrb[24].mxu1 }
 0x22b   :  { %v1427_v17 = vpop.f32.mrb[25].mxu1 }
 0x22c   :  { %v1428_v62 = vadd.f32 %v1427_v17, %v1426_v12  ;;  %v1429_v24 = vpop.f32.mrb[26].mxu1  ;;  %v1533_v36 = vpack.c.bf16 %v1162_v18, %v1161_v30  ;;  %v1175_v30 = vstv %s2225_s6 }
 0x22d   :  { %v1430_v46 = vpop.f32.mrb[27].mxu1 }
 0x22e   :  { %v1103_v54 = vadd.f32 %v1428_v62, %v2137_v33  ;;  %v1431_v55 = vadd.f32 %v1430_v46, %v1429_v24  ;;  %1534 = vmatprep.subr.bf16.mxu0 %v1533_v36 }
 0x22f   :  { %1536 = vmatpush3.bf16.msra.mxu0 %v2182_v44 }
 0x230   :  { %v1106_v31 = vadd.f32 %v1431_v55, %v2139_v59  ;;  %v1163_v57 = vmax.f32 %v1103_v54, 0.0 }
 0x232   :  { %v1164_v0 = vmax.f32 %v1106_v31, 0.0  ;;  %v1432_v58 = vpop.f32.mrb[28].mxu1 }
 0x233   :  { %v1433_v29 = vpop.f32.mrb[29].mxu1 }
 0x234   :  { %v1434_v60 = vadd.f32 %v1433_v29, %v1432_v58  ;;  %v1435_v63 = vpop.f32.mrb[30].mxu1  ;;  %v1537_v56 = vpack.c.bf16 %v1164_v0, %v1163_v57 }
 0x235   :  { %v1436_v1 = vpop.f32.mrb[31].mxu1 }
 0x236   :  { %v1111_v2 = vadd.f32 %v1434_v60, %v2150_v40  ;;  %v1437_v28 = vadd.f32 %v1436_v1, %v1435_v63  ;;  %1538 = vmatprep.subr.bf16.mxu0 %v1537_v56 }
 0x237   :  { %1540 = vmatpush3.bf16.msra.mxu0 %v1539_v3 }
 0x238   :  { %v1114_v33 = vadd.f32 %v1437_v28, %v2152_v50  ;;  %v1165_v4 = vmax.f32 %v1111_v2, 0.0 }
 0x23a   :  { %v1166_v5 = vmax.f32 %v1114_v33, 0.0  ;;  %v1438_v44 = vpop.f32.mrb[32].mxu1 }
 0x23b   :  { %v1439_v42 = vpop.f32.mrb[33].mxu1 }
 0x23c   :  { %v1440_v59 = vadd.f32 %v1439_v42, %v1438_v44  ;;  %v1441_v6 = vpop.f32.mrb[34].mxu1  ;;  %v1541_v19 = vpack.c.bf16 %v1166_v5, %v1165_v4 }
 0x23d   :  { %v1442_v8 = vpop.f32.mrb[35].mxu1 }
 0x23e   :  { %v1119_v9 = vadd.f32 %v1440_v59, %v2158_v51  ;;  %v1443_v39 = vadd.f32 %v1442_v8, %v1441_v6  ;;  %1542 = vmatprep.subr.bf16.mxu0 %v1541_v19 }
 0x23f   :  { %1544 = vmatpush3.bf16.msra.mxu0 %v1543_v37 }
 0x240   :  { %v1122_v40 = vadd.f32 %v1443_v39, %v2160_v52  ;;  %v1167_v21 = vmax.f32 %v1119_v9, 0.0 }
 0x242   :  { %v1168_v10 = vmax.f32 %v1122_v40, 0.0  ;;  %v1444_v3 = vpop.f32.mrb[36].mxu1 }
 0x243   :  { %v1445_v11 = vpop.f32.mrb[37].mxu1 }
 0x244   :  { %v1446_v50 = vadd.f32 %v1445_v11, %v1444_v3  ;;  %v1447_v13 = vpop.f32.mrb[38].mxu1  ;;  %v1545_v15 = vpack.c.bf16 %v1168_v10, %v1167_v21 }
 0x245   :  { %v1448_v16 = vpop.f32.mrb[39].mxu1 }
 0x246   :  { %v1127_v26 = vadd.f32 %v1446_v50, %v2162_v53  ;;  %v1449_v27 = vadd.f32 %v1448_v16, %v1447_v13  ;;  %1546 = vmatprep.subr.bf16.mxu0 %v1545_v15 }
 0x247   :  { %1548 = vmatpush3.bf16.msra.mxu0 %v2170_v20 }
 0x248   :  { %v1130_v51 = vadd.f32 %v1449_v27, %v2164_v41  ;;  %v1169_v22 = vmax.f32 %v1127_v26, 0.0 }
 0x24a   :  { %v1170_v34 = vmax.f32 %v1130_v51, 0.0  ;;  %v1450_v23 = vpop.f32.mrb[40].mxu1 }
 0x24b   :  { %v1451_v52 = vpop.f32.mrb[41].mxu1 }
 0x24c   :  { %v1452_v37 = vadd.f32 %v1451_v52, %v1450_v23  ;;  %v1453_v32 = vpop.f32.mrb[42].mxu1  ;;  %v1549_v14 = vpack.c.bf16 %v1170_v34, %v1169_v22 }
 0x24d   :  { %v1454_v47 = vpop.f32.mrb[43].mxu1 }
 0x24e   :  { %v1135_v25 = vadd.f32 %v1452_v37, %v2166_v7  ;;  %v1455_v38 = vadd.f32 %v1454_v47, %v1453_v32  ;;  %1550 = vmatprep.subr.bf16.mxu0 %v1549_v14 }
 0x24f   :  { %1552 = vmatpush3.bf16.msra.mxu0 %v2178_v35 }
 0x250   :  { %v1138_v53 = vadd.f32 %v1455_v38, %v2174_v61  ;;  %v1171_v43 = vmax.f32 %v1135_v25, 0.0 }
 0x252   :  { %v1172_v20 = vmax.f32 %v1138_v53, 0.0 }
 0x254   :  { %v1553_v48 = vpack.c.bf16 %v1172_v20, %v1171_v43 }
 0x256   :  { %1554 = vmatprep.subr.bf16.mxu0 %v1553_v48 }
 0x257   :  { %1556 = vmatpush3.bf16.msra.mxu0 %v2184_v45 }
 0x25a   :  { %1252 = vmatmul.mubr.f32.vlgmr.msra.gmra.mrb[52].mxu0 %v2146_v49 }
 0x32d   :  { %v1488_v41 = vpop.f32.mrb[52].mxu0 }
 0x32e   :  { %v1489_v7 = vpop.f32.mrb[53].mxu0 }
 0x32f   :  { %v1490_v18 = vadd.f32 %v1489_v7, %v1488_v41 }
 0x331   :  { %v1254_v12 = vadd.f32 %v1490_v18, %v1175_v30 }
 0x333   :  { %1258 = vst.msk [vmem:[%s2226_s7] sm:$0x1] %vm1257_vm2, %v1254_v12 }

</bundles_post_ra>
